<compile_context>
chip_gen: v7x
topology: tpu7x:2x2x1
jax: 0.10.0
libtpu: 0.0.40
codegen_flags: <defaults>
</compile_context>

<pallas_src>
import functools
import math

import jax
import jax.numpy as jnp
from jax.experimental import pallas as pl
from jax.experimental.pallas import tpu as pltpu

LANE = 128      # vreg lane width.
                # TODO(synk): use 256-granular padding/tiling (and optionally
                # fp8 weights on v7x) for non-toy feature sizes on v6e/v7x
                # (2x256x256 MXU); 128 already saturates v5e's 4x128x128.
SUBLANE = 8     # f32 sublane count


def _round_up(n, m):
    return ((n + m - 1) // m) * m


def _pad2d(a, rows, cols):
    r, c = a.shape
    if r == rows and c == cols:
        return a
    return jnp.pad(a, ((0, rows - r), (0, cols - c)))


def _fused_mlp_kernel(x_ref, *refs, n_layers):
    """Whole MLP in one kernel body.

    refs = (w1, b1, w2, b2, ..., wn, bn, o_ref). Weights arrive in bf16 (the
    MXU operand dtype); every matmul accumulates in f32 via
    preferred_element_type; bias add and ReLU stay f32. Hidden intermediates
    live entirely in vregs/VMEM and never touch HBM. Hidden layers: ReLU;
    final layer: no activation (final_act=None).
    """
    o_ref = refs[-1]
    h = x_ref[...].astype(jnp.float32)
    for li in range(n_layers):
        w = refs[2 * li][...]                              # bf16
        b = refs[2 * li + 1][...].astype(jnp.float32)
        h = jnp.dot(h.astype(jnp.bfloat16), w,
                    preferred_element_type=jnp.float32) + b
        if li < n_layers - 1:
            h = jnp.maximum(h, 0.0)
    o_ref[...] = h.astype(o_ref.dtype)


def init_mlp_params(key, layers):
    """Deterministic init mimicking nn.Linear default (uniform +-1/sqrt(in)).

    Returns a list of (W, b) with W shaped (in, out) and b shaped (1, out)."""
    params = []
    for i in range(1, len(layers)):
        fan_in, fan_out = layers[i - 1], layers[i]
        key, kw, kb = jax.random.split(key, 3)
        bound = 1.0 / math.sqrt(fan_in)
        W = jax.random.uniform(kw, (fan_in, fan_out), jnp.float32, -bound, bound)
        b = jax.random.uniform(kb, (1, fan_out), jnp.float32, -bound, bound)
        params.append((W, b))
    return params


def pad_params(params, in_dim, lane=LANE):
    """Pad only the *hidden* feature dims to lane multiples.

    The first layer's input dim and the last layer's output dim stay at their
    logical sizes (their blocks span the full array dim, which is exempt from
    the (8,128) rule), so activations never need wrapper-side padding/slicing.
    Zero padding is exact: padded input rows meet zero weight columns, padded
    output columns get zero weights + zero bias, and ReLU(0)=0.
    Weights are stored bf16 (MXU operand dtype), biases f32."""
    dims = [in_dim] + [w.shape[1] for (w, _) in params]
    pdims = list(dims)
    for i in range(1, len(dims) - 1):
        pdims[i] = _round_up(dims[i], lane)
    flat = []
    for i, (w, b) in enumerate(params):
        flat.append(_pad2d(w, pdims[i], pdims[i + 1]).astype(jnp.bfloat16))
        flat.append(_pad2d(b, 1, pdims[i + 1]).astype(jnp.float32))
    return flat, dims, pdims


def _vmem_budget(flat_wb, bm, in_dim, out_dim, max_hidden):
    """Scoped-VMEM request: resident weights + double-buffered x/out row
    tiles + live f32 intermediates, with 2x headroom for compiler temps."""
    wb = sum(int(a.size) * a.dtype.itemsize for a in flat_wb)
    act = 2 * 4 * bm * (in_dim + out_dim)
    inter = 2 * 4 * bm * max(max_hidden, 1)
    total = 2 * (wb + act + inter)
    return int(min(max(total, 4 << 20), 64 << 20))


def mlp_forward(x, flat_wb, dims, pdims, *, block_rows=512, gridless_max=256):
    """Fused forward pass.

    B <= gridless_max : one grid-less invocation (whole arrays = single VMEM
                        blocks; no padding or slicing at all).
    B >  gridless_max : grid over row tiles; weights/biases stay VMEM-resident
                        across the grid; batch axis marked "parallel" so
                        multi-TensorCore chips (v7x) split the work.
    """
    B = x.shape[0]
    n_layers = len(flat_wb) // 2
    in_dim, out_dim = dims[0], dims[-1]
    max_hidden = max(pdims)
    kernel = functools.partial(_fused_mlp_kernel, n_layers=n_layers)

    # TODO(synk): once total resident weights exceed ~16-24 MiB (v7x has
    # 64 MiB VMEM/TC), switch to N/K grid axes with an f32 accumulator scratch
    # + pl.when init/finalize instead of keeping every layer's weight resident.

    if B <= gridless_max:
        return pl.pallas_call(
            kernel,
            out_shape=jax.ShapeDtypeStruct((B, out_dim), x.dtype),
            compiler_params=pltpu.CompilerParams(
                vmem_limit_bytes=_vmem_budget(flat_wb, max(B, SUBLANE),
                                              in_dim, out_dim, max_hidden)),
        )(x, *flat_wb)

    # Batch-tiled path. Row tile: large (amortizes ~0.35us/step, nears the HBM
    # roofline) but at least 2 tiles so both v7x TensorCores get work.
    bm = max(SUBLANE, min(block_rows, _round_up((B + 1) // 2, SUBLANE)))
    n_tiles = (B + bm - 1) // bm
    b_pad = n_tiles * bm
    x_p = x if b_pad == B else jnp.pad(x, ((0, b_pad - B), (0, 0)))

    def build(single_buffer_weights):
        # Grid-invariant operands (index_map -> (0,0)) gain nothing from
        # double buffering; Buffered(1) keeps a single resident copy.
        wkw = ({"pipeline_mode": pl.Buffered(1)}
               if single_buffer_weights else {})
        in_specs = [pl.BlockSpec((bm, in_dim), lambda i: (i, 0))]
        for li in range(n_layers):
            in_specs.append(pl.BlockSpec((pdims[li], pdims[li + 1]),
                                         lambda i: (0, 0), **wkw))
            in_specs.append(pl.BlockSpec((1, pdims[li + 1]),
                                         lambda i: (0, 0), **wkw))
        return pl.pallas_call(
            kernel,
            out_shape=jax.ShapeDtypeStruct((b_pad, out_dim), x.dtype),
            grid_spec=pl.GridSpec(
                grid=(n_tiles,),
                in_specs=in_specs,
                out_specs=pl.BlockSpec((bm, out_dim), lambda i: (i, 0)),
            ),
            compiler_params=pltpu.CompilerParams(
                dimension_semantics=("parallel",),
                vmem_limit_bytes=_vmem_budget(flat_wb, bm, in_dim, out_dim,
                                              max_hidden)),
        )

    try:
        out = jax.block_until_ready(build(True)(x_p, *flat_wb))
    except Exception:
        # Fallback for JAX builds where BlockSpec.pipeline_mode / pl.Buffered
        # is unavailable at the top-level pallas_call: identical kernel,
        # default (double-buffered) weight pipelining.
        out = jax.block_until_ready(build(False)(x_p, *flat_wb))

    return out if b_pad == B else out[:B]


# TODO(synk): batch_norm / dropout / prelu / sigmoid / tanh / softplus variants
# of the torch module are not exercised by the default constructor args and
# are omitted.


if __name__ == "__main__":
    layers = (16, 32, 32, 8)   # (input_dim, hidden_dim, hidden_dim, output_dim)
    batch = 8

    key = jax.random.PRNGKey(0)
    key, kx = jax.random.split(key)
    x = jax.random.normal(kx, (batch, layers[0]), jnp.float32)

    params = init_mlp_params(key, layers)
    flat_wb, dims, pdims = pad_params(params, layers[0])

    def ref_forward(xx, bf16_dots=True):
        h = xx
        for i, (W, b) in enumerate(params):
            if bf16_dots:   # same operand dtypes as the kernel's MXU path
                h = jnp.dot(h.astype(jnp.bfloat16), W.astype(jnp.bfloat16),
                            preferred_element_type=jnp.float32) + b
            else:
                h = h @ W + b
            if i < len(params) - 1:
                h = jnp.maximum(h, 0.0)
        return h

    # --- small-batch (grid-less fused) path ---
    out = jax.block_until_ready(mlp_forward(x, flat_wb, dims, pdims))
    assert out.shape == (batch, layers[-1])
    assert jnp.allclose(out, ref_forward(x), atol=2e-3, rtol=2e-3)
    assert jnp.allclose(out, ref_forward(x, bf16_dots=False),
                        atol=5e-2, rtol=5e-2)

    # --- batch-tiled ("parallel" grid, >=2 row tiles) path ---
    key, kx2 = jax.random.split(key)
    x_big = jax.random.normal(kx2, (512, layers[0]), jnp.float32)
    out_big = jax.block_until_ready(mlp_forward(x_big, flat_wb, dims, pdims))
    assert out_big.shape == (512, layers[-1])
    assert jnp.allclose(out_big, ref_forward(x_big), atol=2e-3, rtol=2e-3)

    print("KERNEL_OK")
</pallas_src>

<mosaic_0001>
module attributes {stable_mosaic.version = 11 : i64} {
  func.func @_fused_mlp_kernel(%arg0: memref<8x16xf32, #tpu.memory_space<vmem>>, %arg1: memref<16x128xbf16, #tpu.memory_space<vmem>>, %arg2: memref<1x128xf32, #tpu.memory_space<vmem>>, %arg3: memref<128x128xbf16, #tpu.memory_space<vmem>>, %arg4: memref<1x128xf32, #tpu.memory_space<vmem>>, %arg5: memref<128x8xbf16, #tpu.memory_space<vmem>>, %arg6: memref<1x8xf32, #tpu.memory_space<vmem>>, %arg7: memref<8x8xf32, #tpu.memory_space<vmem>>) attributes {dimension_semantics = [], scalar_prefetch = 0 : i64, scratch_operands = 0 : i64, tpu.core_type = #tpu.core_type<tc>} {
    %c0 = arith.constant 0 : index
    %c0_0 = arith.constant 0 : index
    %0 = vector.load %arg0[%c0, %c0_0] : memref<8x16xf32, #tpu.memory_space<vmem>>, vector<8x16xf32>
    %c0_1 = arith.constant 0 : index
    %c0_2 = arith.constant 0 : index
    %1 = vector.load %arg1[%c0_1, %c0_2] : memref<16x128xbf16, #tpu.memory_space<vmem>>, vector<16x128xbf16>
    %c0_3 = arith.constant 0 : index
    %c0_4 = arith.constant 0 : index
    %2 = vector.load %arg2[%c0_3, %c0_4] : memref<1x128xf32, #tpu.memory_space<vmem>>, vector<1x128xf32>
    %3 = arith.truncf %0 : vector<8x16xf32> to vector<8x16xbf16>
    %cst = arith.constant dense<0.000000e+00> : vector<8x128xf32>
    %4 = tpu.matmul %3, %1, %cst {dimension_numbers = #tpu.dot_dimension_numbers<[1], [0], [0], [1], [0, 0, 1, 1], [], []>} : vector<8x16xbf16>, vector<16x128xbf16>, vector<8x128xf32> -> vector<8x128xf32>
    %5 = vector.broadcast %2 : vector<1x128xf32> to vector<8x128xf32>
    %6 = arith.addf %4, %5 : vector<8x128xf32>
    %cst_5 = arith.constant 0.000000e+00 : f32
    %7 = vector.broadcast %cst_5 : f32 to vector<8x128xf32>
    %8 = arith.maximumf %6, %7 : vector<8x128xf32>
    %c0_6 = arith.constant 0 : index
    %c0_7 = arith.constant 0 : index
    %9 = vector.load %arg3[%c0_6, %c0_7] : memref<128x128xbf16, #tpu.memory_space<vmem>>, vector<128x128xbf16>
    %c0_8 = arith.constant 0 : index
    %c0_9 = arith.constant 0 : index
    %10 = vector.load %arg4[%c0_8, %c0_9] : memref<1x128xf32, #tpu.memory_space<vmem>>, vector<1x128xf32>
    %11 = arith.truncf %8 : vector<8x128xf32> to vector<8x128xbf16>
    %cst_10 = arith.constant dense<0.000000e+00> : vector<8x128xf32>
    %12 = tpu.matmul %11, %9, %cst_10 {dimension_numbers = #tpu.dot_dimension_numbers<[1], [0], [0], [1], [0, 0, 1, 1], [], []>} : vector<8x128xbf16>, vector<128x128xbf16>, vector<8x128xf32> -> vector<8x128xf32>
    %13 = vector.broadcast %10 : vector<1x128xf32> to vector<8x128xf32>
    %14 = arith.addf %12, %13 : vector<8x128xf32>
    %cst_11 = arith.constant 0.000000e+00 : f32
    %15 = vector.broadcast %cst_11 : f32 to vector<8x128xf32>
    %16 = arith.maximumf %14, %15 : vector<8x128xf32>
    %c0_12 = arith.constant 0 : index
    %c0_13 = arith.constant 0 : index
    %17 = vector.load %arg5[%c0_12, %c0_13] : memref<128x8xbf16, #tpu.memory_space<vmem>>, vector<128x8xbf16>
    %c0_14 = arith.constant 0 : index
    %c0_15 = arith.constant 0 : index
    %18 = vector.load %arg6[%c0_14, %c0_15] : memref<1x8xf32, #tpu.memory_space<vmem>>, vector<1x8xf32>
    %19 = arith.truncf %16 : vector<8x128xf32> to vector<8x128xbf16>
    %cst_16 = arith.constant dense<0.000000e+00> : vector<8x8xf32>
    %20 = tpu.matmul %19, %17, %cst_16 {dimension_numbers = #tpu.dot_dimension_numbers<[1], [0], [0], [1], [0, 0, 1, 1], [], []>} : vector<8x128xbf16>, vector<128x8xbf16>, vector<8x8xf32> -> vector<8x8xf32>
    %21 = vector.broadcast %18 : vector<1x8xf32> to vector<8x8xf32>
    %22 = arith.addf %20, %21 : vector<8x8xf32>
    %c0_17 = arith.constant 0 : index
    %c0_18 = arith.constant 0 : index
    %23 = vector.load %arg7[%c0_17, %c0_18] : memref<8x8xf32, #tpu.memory_space<vmem>>, vector<8x8xf32>
    tpu.vector_store %arg7[%c0_17, %c0_18], %22 {strides = array<i32>} : memref<8x8xf32, #tpu.memory_space<vmem>>, vector<8x8xf32>,
    return
  }
}

</mosaic_0001>

<bundles_post_ra>
// kernel: tpu_custom_call.1
= control target key start
LH: loop header
LB: loop body
LE: loop exit
PB: predicated region body
PF: predicated region fallthrough
CT: control target
= control target key end

     0   :  { %12 = vsyncpa [#allocation3], 0  ;;  %s654_s0 = inlined_call_operand.vmem [shape: f32[8,16], index: 0, kind: input, shape index: {}]   ;;  %s655_s1 = inlined_call_operand.hbm [shape: bf16[16,128], index: 1, kind: input, shape index: {}]   ;;  %s656_s2 = inlined_call_operand.vmem [shape: f32[1,128], index: 2, kind: input, shape index: {}]   ;;  %s657_s3 = inlined_call_operand.vmem [shape: bf16[128,128], index: 3, kind: input, shape index: {}]   ;;  %s658_s4 = inlined_call_operand.vmem [shape: f32[1,128], index: 4, kind: input, shape index: {}]   ;;  %s659_s5 = inlined_call_operand.vmem [shape: bf16[128,8], index: 5, kind: input, shape index: {}]   ;;  %s660_s6 = inlined_call_operand.vmem [shape: f32[1,8], index: 6, kind: input, shape index: {}]   ;;  %s661_s7 = inlined_call_operand.hbm [shape: f32[8,8], index: 7, kind: output, shape index: {}]  }
   0x1   :  { %13 = vsyncpa [#allocation4], 0  ;;  %s504_s24 = smov [#allocation2]   ;;  %s456_s28 = scalar_lea.hbm %s655_s1, 128 }
   0x2   :  { %s21_s25 = sshll.u32 %s504_s24, 4  ;;  %p457_p0 = scmp.ne.s32.totalorder %s655_s1, %s456_s28  ;;  %s22_s25 = int_to_ptr.vmem [resolvable:$true] %s21_s25 }
   0x3   :  { %p460_p1 = scmp.lt.u32.totalorder %s456_s28, %s655_s1 }
   0x5   :  { %p462_p2 = pnand %p460_p1, %p457_p0 }
   0x7   :  { %465 = shalt.err (!%p462_p2)
}
   0x8   :  { %s466_s10 = scalar_lea.vmem %s22_s25, 128  ;;  %p471_p4 = scmp.lt.s32.totalorder %s22_s25, %s22_s25 }
   0x9   :  { %p467_p3 = scmp.ne.s32.totalorder %s22_s25, %s466_s10  ;;  %p472_p5 = scmp.lt.s32.totalorder %s466_s10, %s466_s10 }
   0xb   :  { %p473_p6 = por %p472_p5, %p471_p4 }
   0xd   :  { %p474_p7 = pnand %p473_p6, %p467_p3 }
   0xf   :  { %477 = shalt.err (!%p474_p7)
}
  0x10   :  { %s505_s11 = smov 64   ;;  %s506_s12 = smov 4  }
  0x11   :  { %27 = dma.hbm_to_vmem [thread:$0]  %s655_s1, 128, %s22_s25, [#allocation3], %s505_s11, %s505_s11, %s506_s12  }
  0x12   :  { %500 = dma.done.wait [#allocation3], 128  }
  0x13   :  { %501 = vsyncadd [#allocation3], 4294967168  ;;  %v507_v0 = vmov 0.0   ;;  %vm508_vm0 = vmmov 0   ;;  %v439_v1 = vld [vmem:[#allocation2] sm:$0xff]   ;;  %vm59_vm1 = vcmask 130048  }
  0x14   :  { %387 = vmatprep.subr.bf16.mxu0 %v507_v0  ;;  %389 = vmatprep.mubr.msk.bf16.mxu0 %vm508_vm0, %v507_v0  ;;  %v42_v2 = vld [vmem:[%s654_s0] sm:$0xff]  ;;  %v441_v5 = vld [vmem:[%s657_s3 + $0x8] sm:$0xff]   ;;  %v442_v6 = vld [vmem:[%s657_s3 + $0x10] sm:$0xff]   ;;  %s509_s26 = smov [#allocation5]   ;;  %vm329_vm2 = vcmask 64512  }
  0x15   :  { %393 = vmatprep.subr.bf16.mxu1 %v507_v0  ;;  %409 = vmatprep.mubr.msk.bf16.mxu1 %vm508_vm0, %v507_v0  ;;  %v46_v3 = vpack.c.bf16 %v42_v2, %v42_v2  ;;  %v440_v4 = vld [vmem:[%s657_s3] sm:$0xff]   ;;  %v443_v7 = vld [vmem:[%s657_s3 + $0x18] sm:$0xff]   ;;  %v445_v9 = vld [vmem:[%s657_s3 + $0x28] sm:$0xff]   ;;  %s337_s27 = sshll.u32 %s509_s26, 4  ;;  %s338_s27 = int_to_ptr.vmem [resolvable:$true] %s337_s27 }
  0x16   :  { %388 = vmatpush3.bf16.msra.mxu0 %v439_v1  ;;  %394 = vmatpush3.bf16.msra.mxu1 %v440_v4  ;;  %v444_v8 = vld [vmem:[%s657_s3 + $0x20] sm:$0xff]   ;;  %v446_v10 = vld [vmem:[%s657_s3 + $0x30] sm:$0xff]   ;;  %v447_v11 = vld [vmem:[%s657_s3 + $0x38] sm:$0xff]   ;;  %p483_p9 = scmp.lt.s32.totalorder %s338_s27, %s338_s27 }
  0x17   :  { %413 = vmatprep.subr.bf16.mxu0 %v507_v0  ;;  %395 = vmatprep.subr.bf16.mxu1 %v507_v0  ;;  %v448_v12 = vld [vmem:[%s659_s5] sm:$0xff]   ;;  %v449_v13 = vld [vmem:[%s659_s5 + $0x8] sm:$0xff]   ;;  %v450_v14 = vld [vmem:[%s659_s5 + $0x10] sm:$0xff]  }
  0x18   :  { %v451_v15 = vld [vmem:[%s659_s5 + $0x18] sm:$0xff]   ;;  %v452_v16 = vld [vmem:[%s659_s5 + $0x20] sm:$0xff]   ;;  %v453_v17 = vld [vmem:[%s659_s5 + $0x28] sm:$0xff]  }
  0x19   :  { %390 = vmatmul.mubr.msk.bf16.vlgmr.msra.gmra.mrb[0].mxu0 %vm59_vm1, %v46_v3  ;;  %v346_v18 = vld [vmem:[%s656_s2] ss:$0 sm:$0xff]  ;;  %v454_v26 = vld [vmem:[%s659_s5 + $0x30] sm:$0xff]   ;;  %v455_v27 = vld [vmem:[%s659_s5 + $0x38] sm:$0xff]  }
  0x1a   :  { %429 = vmatprep.mubr.msk.bf16.mxu0 %vm508_vm0, %v507_v0  ;;  %396 = vmatpush3.bf16.msra.mxu1 %v441_v5  ;;  %v349_v28 = vld [vmem:[%s658_s4] ss:$0 sm:$0xff]  ;;  %s478_s4 = scalar_lea.vmem %s338_s27, 128 }
  0x1b   :  { %397 = vmatprep.subr.bf16.mxu1 %v507_v0  ;;  %414 = vmatpush3.bf16.msra.mxu0 %v448_v12  ;;  %v358_v36 = vld [vmem:[%s660_s6] ss:$0 sm:$0xff]  ;;  %p479_p8 = scmp.ne.s32.totalorder %s338_s27, %s478_s4  ;;  %p484_p10 = scmp.lt.s32.totalorder %s478_s4, %s478_s4 }
  0x1c   :  { %415 = vmatprep.subr.bf16.mxu0 %v507_v0 }
  0x1d   :  { %p485_p11 = por %p484_p10, %p483_p9 }
  0x1e   :  { %398 = vmatpush3.bf16.msra.mxu1 %v442_v6 }
  0x1f   :  { %399 = vmatprep.subr.bf16.mxu1 %v507_v0  ;;  %416 = vmatpush3.bf16.msra.mxu0 %v449_v13  ;;  %p486_p12 = pnand %p485_p11, %p479_p8 }
  0x20   :  { %417 = vmatprep.subr.bf16.mxu0 %v507_v0 }
  0x22   :  { %400 = vmatpush3.bf16.msra.mxu1 %v443_v7 }
  0x23   :  { %401 = vmatprep.subr.bf16.mxu1 %v507_v0  ;;  %418 = vmatpush3.bf16.msra.mxu0 %v450_v14 }
  0x24   :  { %419 = vmatprep.subr.bf16.mxu0 %v507_v0 }
  0x26   :  { %402 = vmatpush3.bf16.msra.mxu1 %v444_v8 }
  0x27   :  { %403 = vmatprep.subr.bf16.mxu1 %v507_v0  ;;  %420 = vmatpush3.bf16.msra.mxu0 %v451_v15 }
  0x28   :  { %421 = vmatprep.subr.bf16.mxu0 %v507_v0 }
  0x2a   :  { %404 = vmatpush3.bf16.msra.mxu1 %v445_v9 }
  0x2b   :  { %405 = vmatprep.subr.bf16.mxu1 %v507_v0  ;;  %422 = vmatpush3.bf16.msra.mxu0 %v452_v16 }
  0x2c   :  { %423 = vmatprep.subr.bf16.mxu0 %v507_v0 }
  0x2e   :  { %406 = vmatpush3.bf16.msra.mxu1 %v446_v10 }
  0x2f   :  { %407 = vmatprep.subr.bf16.mxu1 %v507_v0  ;;  %424 = vmatpush3.bf16.msra.mxu0 %v453_v17 }
  0x30   :  { %425 = vmatprep.subr.bf16.mxu0 %v507_v0 }
  0x32   :  { %408 = vmatpush3.bf16.msra.mxu1 %v447_v11 }
  0x33   :  { %426 = vmatpush3.bf16.msra.mxu0 %v454_v26 }
  0x34   :  { %427 = vmatprep.subr.bf16.mxu0 %v507_v0 }
  0x37   :  { %428 = vmatpush3.bf16.msra.mxu0 %v455_v27 }
  0xec   :  { %v97_v19 = vpop.f32.mrb[0].mxu0 }
  0xed   :  { %v98_v20 = vadd.f32 %v346_v18, %v97_v19  ;;  %v391_v21 = vpop.f32.mrb[1].mxu0 }
  0xee   :  { %v100_v22 = vpop.f32.mrb[2].mxu0 }
  0xef   :  { %v103_v23 = vmax.f32 %v98_v20, 0.0  ;;  %v392_v24 = vpop.f32.mrb[3].mxu0 }
  0xf1   :  { %v121_v25 = vpack.c.bf16 %v103_v23, %v103_v23 }
  0xf3   :  { %410 = vmatmul.mubr.bf16.vlgmr.msra.gmra.mrb[0].mxu1 %v121_v25 }
 0x1c6   :  { %v210_v29 = vpop.f32.mrb[0].mxu1 }
 0x1c7   :  { %v211_v30 = vadd.f32 %v349_v28, %v210_v29  ;;  %v411_v31 = vpop.f32.mrb[1].mxu1 }
 0x1c8   :  { %v213_v32 = vpop.f32.mrb[2].mxu1 }
 0x1c9   :  { %v216_v33 = vmax.f32 %v211_v30, 0.0  ;;  %v412_v34 = vpop.f32.mrb[3].mxu1 }
 0x1cb   :  { %v234_v35 = vpack.c.bf16 %v216_v33, %v216_v33 }
 0x1cd   :  { %430 = vmatmul.mubr.bf16.vlgmr.msra.gmra.mrb[4].mxu0 %v234_v35 }
 0x2a0   :  { %v323_v37 = vpop.f32.mrb[4].mxu0 }
 0x2a1   :  { %v324_v38 = vadd.f32 %v358_v36, %v323_v37  ;;  %v431_v39 = vpop.f32.mrb[5].mxu0 }
 0x2a2   :  { %v326_v40 = vpop.f32.mrb[6].mxu0 }
 0x2a3   :  { %v432_v41 = vpop.f32.mrb[7].mxu0  ;;  %330 = vst.msk [vmem:[#allocation5] sm:$0xff] %vm329_vm2, %v324_v38 }
 0x2a4   :  { %489 = shalt.err (!%p486_p12)
}
 0x2a5   :  { %s490_s6 = scalar_lea.hbm %s661_s7, 128 }
 0x2a6   :  { %p491_p13 = scmp.ne.s32.totalorder %s661_s7, %s490_s6  ;;  %p494_p0 = scmp.lt.u32.totalorder %s490_s6, %s661_s7 }
 0x2a8   :  { %p496_p1 = pnand %p494_p0, %p491_p13 }
 0x2aa   :  { %499 = shalt.err (!%p496_p1)
}
 0x2ab   :  { %340 = dma.vmem_to_hbm [thread:$0]  %s338_s27, 128, %s661_s7, [#allocation4]  }
 0x2ac   :  { %502 = dma.done.wait [#allocation4], 128  }
 0x2ad   :  { %503 = vsyncadd [#allocation4], 4294967168 }
 0x2ae   :  { %344 = vsyncpa [#allocation3], 1 }
 0x2af   :  { %345 = vsyncpa [#allocation4], 1 }

</bundles_post_ra>
